<compile_context>
chip_gen: v7x
topology: tpu7x:2x2x1
jax: 0.10.0
libtpu: 0.0.40
codegen_flags: <defaults>
</compile_context>

<pallas_src>
import jax
import jax.numpy as jnp
from jax import lax
from jax.experimental import pallas as pl
from jax.experimental.pallas import tpu as pltpu


def _linear_sub_relu_kernel(x_ref, w_ref, c_ref, o_ref):
    # x_ref: (tm, K), w_ref: (N, K)  (nn.Linear layout, contracted on dim 1),
    # c_ref: (1, N) = (bias - other), o_ref: (tm, N)
    y = lax.dot_general(
        x_ref[...], w_ref[...],
        dimension_numbers=(((1,), (1,)), ((), ())),   # x @ w.T, no transpose op
        preferred_element_type=jnp.float32,
    )
    y = jnp.maximum(y + c_ref[...], 0.0)
    o_ref[...] = y if o_ref.dtype == y.dtype else y.astype(o_ref.dtype)


def _round_up(v, m):
    return (v + m - 1) // m * m


def prepare_params(weight, bias, other):
    """One-time parameter prep, hoisted out of the per-call hot path.

    weight: (N, K) float32 (nn.Linear layout, kept as-is)
    bias:   (N,)   float32
    other:  scalar / (N,) / (1, N) float32 (broadcast over rows)
    Returns (weight, c) where c = bias - other with shape (1, N).
    """
    N = weight.shape[0]
    c = (bias.reshape(1, N).astype(jnp.float32)
         - jnp.broadcast_to(jnp.asarray(other, jnp.float32), (1, N)))
    return weight, c


@jax.jit
def linear_sub_relu(x, weight, c):
    """Fused relu(x @ weight.T + c), c = bias - other (pre-folded).

    x:      (B, K) float32
    weight: (N, K) float32
    c:      (1, N) float32
    """
    B, K = x.shape
    N = weight.shape[0]

    # Row tiling:
    #  * B <= 512: single block whose dims equal the full array dims
    #    (always legal) -> no row padding, no output slice, grid=(1,).
    #  * B  > 512: tm=512 sublane-aligned tiles -> >=2 grid steps, so the
    #    "parallel" axis shards across both v7x TensorCores. Per-block VMEM
    #    (x 128 KiB + out 128 KiB, double-buffered) is far under the scoped
    #    VMEM default on every generation (v5e 16 MiB, v6e/v7x 32 MiB).
    tm = B if B <= 512 else 512
    Mp = _round_up(B, tm)
    x_p = x if Mp == B else jnp.zeros((Mp, K), x.dtype).at[:B].set(x)

    out_p = pl.pallas_call(
        _linear_sub_relu_kernel,
        out_shape=jax.ShapeDtypeStruct((Mp, N), x.dtype),
        grid=(Mp // tm,),
        in_specs=[
            pl.BlockSpec((tm, K), lambda i: (i, 0)),   # activations, row-tiled
            pl.BlockSpec((N, K), lambda i: (0, 0)),    # weight: VMEM-resident
            pl.BlockSpec((1, N), lambda i: (0, 0)),    # folded (bias - other)
        ],
        out_specs=pl.BlockSpec((tm, N), lambda i: (i, 0)),
        compiler_params=pltpu.CompilerParams(
            dimension_semantics=("parallel",),
        ),
    )(x_p, weight, c)

    # Row-only slice, and only when padding was actually added.
    return out_p if Mp == B else out_p[:B]


if __name__ == "__main__":
    # Shapes implied by the module: x1 = randn(1, 64), Linear(64, 64)
    B, K, N = 1, 64, 64

    key = jax.random.PRNGKey(0)
    kx, kw, kb, ko = jax.random.split(key, 4)

    x1 = jax.random.normal(kx, (B, K), dtype=jnp.float32)
    # Deterministic synthetic "parameters" (not a checkpoint load)
    weight = jax.random.normal(kw, (N, K), dtype=jnp.float32) * (1.0 / jnp.sqrt(K))
    bias = jax.random.normal(kb, (N,), dtype=jnp.float32) * 0.1
    other = jax.random.normal(ko, (1, N), dtype=jnp.float32)

    # Parameter prep happens once, outside the hot path.
    w_ready, c_ready = prepare_params(weight, bias, other)

    out = linear_sub_relu(x1, w_ready, c_ready)
    out = jax.block_until_ready(out)

    # Reference check in plain JAX (same math as the PyTorch forward)
    ref = jnp.maximum(x1 @ weight.T + bias - other, 0.0)
    assert out.shape == (B, N)
    assert jnp.allclose(out, ref, atol=1e-5, rtol=1e-5)

    print("KERNEL_OK")
</pallas_src>

<mosaic_0001>
module attributes {stable_mosaic.version = 11 : i64} {
  func.func @_linear_sub_relu_kernel(%arg0: i32, %arg1: memref<1x64xf32, #tpu.memory_space<vmem>>, %arg2: memref<64x64xf32, #tpu.memory_space<vmem>>, %arg3: memref<1x64xf32, #tpu.memory_space<vmem>>, %arg4: memref<1x64xf32, #tpu.memory_space<vmem>>) attributes {dimension_semantics = [#tpu.dimension_semantics<parallel>], iteration_bounds = array<i64: 1>, scalar_prefetch = 0 : i64, scratch_operands = 0 : i64, tpu.core_type = #tpu.core_type<tc>, window_params = [{transform_indices = @transform_0, window_bounds = array<i64: 1, 64>}, {pipeline_mode = #tpu.pipeline_mode<synchronous>, transform_indices = @transform_1, window_bounds = array<i64: 64, 64>}, {pipeline_mode = #tpu.pipeline_mode<synchronous>, transform_indices = @transform_2, window_bounds = array<i64: 1, 64>}, {transform_indices = @transform_3, window_bounds = array<i64: 1, 64>}]} {
    %c0 = arith.constant 0 : index
    %c0_0 = arith.constant 0 : index
    %0 = vector.load %arg1[%c0, %c0_0] : memref<1x64xf32, #tpu.memory_space<vmem>>, vector<1x64xf32>
    %c0_1 = arith.constant 0 : index
    %c0_2 = arith.constant 0 : index
    %1 = vector.load %arg2[%c0_1, %c0_2] : memref<64x64xf32, #tpu.memory_space<vmem>>, vector<64x64xf32>
    %cst = arith.constant dense<0.000000e+00> : vector<1x64xf32>
    %2 = tpu.matmul %0, %1, %cst {dimension_numbers = #tpu.dot_dimension_numbers<[1], [1], [0], [0], [0, 0, 1, 0], [], []>} : vector<1x64xf32>, vector<64x64xf32>, vector<1x64xf32> -> vector<1x64xf32>
    %c0_3 = arith.constant 0 : index
    %c0_4 = arith.constant 0 : index
    %3 = vector.load %arg3[%c0_3, %c0_4] : memref<1x64xf32, #tpu.memory_space<vmem>>, vector<1x64xf32>
    %4 = arith.addf %2, %3 : vector<1x64xf32>
    %cst_5 = arith.constant 0.000000e+00 : f32
    %5 = vector.broadcast %cst_5 : f32 to vector<1x64xf32>
    %6 = arith.maximumf %4, %5 : vector<1x64xf32>
    %c0_6 = arith.constant 0 : index
    %c0_7 = arith.constant 0 : index
    %7 = vector.load %arg4[%c0_6, %c0_7] : memref<1x64xf32, #tpu.memory_space<vmem>>, vector<1x64xf32>
    tpu.vector_store %arg4[%c0_6, %c0_7], %6 {strides = array<i32>} : memref<1x64xf32, #tpu.memory_space<vmem>>, vector<1x64xf32>,
    return
  }
  func.func @transform_0(%arg0: i32) -> (i32, i32) {
    %c0_i32 = arith.constant 0 : i32
    %c0_i32_0 = arith.constant 0 : i32
    return %arg0, %c0_i32 : i32, i32
  }
  func.func @transform_1(%arg0: i32) -> (i32, i32) {
    %c0_i32 = arith.constant 0 : i32
    %c0_i32_0 = arith.constant 0 : i32
    %c0_i32_1 = arith.constant 0 : i32
    return %c0_i32, %c0_i32_0 : i32, i32
  }
  func.func @transform_2(%arg0: i32) -> (i32, i32) {
    %c0_i32 = arith.constant 0 : i32
    %c0_i32_0 = arith.constant 0 : i32
    %c0_i32_1 = arith.constant 0 : i32
    return %c0_i32, %c0_i32_0 : i32, i32
  }
  func.func @transform_3(%arg0: i32) -> (i32, i32) {
    %c0_i32 = arith.constant 0 : i32
    %c0_i32_0 = arith.constant 0 : i32
    return %arg0, %c0_i32 : i32, i32
  }
}

</mosaic_0001>

<bundles_post_ra>
// kernel: linear_sub_relu.1
= control target key start
LH: loop header
LB: loop body
LE: loop exit
PB: predicated region body
PF: predicated region fallthrough
CT: control target
= control target key end

     0   :  { %8 = vsyncpa [#allocation3], 0  ;;  %s390_s0 = inlined_call_operand.hbm [shape: f32[1,64], index: 0, kind: input, shape index: {}]   ;;  %s391_s1 = inlined_call_operand.hbm [shape: f32[64,64], index: 1, kind: input, shape index: {}]   ;;  %s392_s2 = inlined_call_operand.vmem [shape: f32[1,64], index: 2, kind: input, shape index: {}]   ;;  %s393_s3 = inlined_call_operand.hbm [shape: f32[1,64], index: 3, kind: output, shape index: {}]  }
   0x1   :  { %9 = vsyncpa [#allocation6], 0 }
   0x2   :  { %10 = vsyncpa [#allocation4], 0  ;;  %s301_s12 = smov [#allocation2]   ;;  %s302_s14 = smov [#allocation5]  }
   0x3   :  { %s17_s13 = sshll.u32 %s301_s12, 4  ;;  %s26_s15 = sshll.u32 %s302_s14, 4  ;;  %s18_s13 = int_to_ptr.vmem [resolvable:$true] %s17_s13  ;;  %s329_s15 = int_to_ptr.vmem [resolvable:$true] %s26_s15 }
   0x4   :  { %s229_s18 = scalar_lea.hbm %s390_s0, 16 }
   0x5   :  { %p230_p0 = scmp.ne.s32.totalorder %s390_s0, %s229_s18  ;;  %p233_p1 = scmp.lt.u32.totalorder %s229_s18, %s390_s0 }
   0x7   :  { %p235_p2 = pnand %p233_p1, %p230_p0 }
   0x9   :  { %238 = shalt.err (!%p235_p2)
}
   0xa   :  { %s239_s23 = scalar_lea.vmem %s18_s13, 16  ;;  %s243_s24 = scalar_lea.vmem %s18_s13, 32 }
   0xb   :  { %p240_p3 = scmp.ne.s32.totalorder %s18_s13, %s239_s23  ;;  %p244_p4 = scmp.lt.s32.totalorder %s18_s13, %s18_s13 }
   0xc   :  { %p245_p5 = scmp.lt.s32.totalorder %s243_s24, %s239_s23 }
   0xe   :  { %p246_p6 = por %p245_p5, %p244_p4 }
  0x10   :  { %p247_p7 = pnand %p246_p6, %p240_p3 }
  0x12   :  { %250 = shalt.err (!%p247_p7)
}
  0x13   :  { %20 = dma.hbm_to_vmem [thread:$0]  %s390_s0, 16, %s18_s13, [#allocation3]  }
  0x14   :  { %s251_s29 = scalar_lea.hbm %s391_s1, 1024 }
  0x15   :  { %p252_p8 = scmp.ne.s32.totalorder %s391_s1, %s251_s29  ;;  %p255_p9 = scmp.lt.u32.totalorder %s251_s29, %s391_s1 }
  0x17   :  { %p257_p10 = pnand %p255_p9, %p252_p8 }
  0x19   :  { %260 = shalt.err (!%p257_p10)
}
  0x1a   :  { %s261_s7 = scalar_lea.vmem %s329_s15, 1024  ;;  %p266_p12 = scmp.lt.s32.totalorder %s329_s15, %s329_s15 }
  0x1b   :  { %p262_p11 = scmp.ne.s32.totalorder %s329_s15, %s261_s7  ;;  %p267_p13 = scmp.lt.s32.totalorder %s261_s7, %s261_s7 }
  0x1d   :  { %p268_p0 = por %p267_p13, %p266_p12 }
  0x1f   :  { %p269_p1 = pnand %p268_p0, %p262_p11 }
  0x21   :  { %272 = shalt.err (!%p269_p1)
}
  0x22   :  { %s303_s0 = smov 128   ;;  %s304_s8 = smov 8  }
  0x23   :  { %32 = dma.hbm_to_vmem [thread:$0]  %s391_s1, 1024, %s329_s15, [#allocation6], %s303_s0, %s303_s0, %s304_s8  }
  0x24   :  { %295 = dma.done.wait [#allocation3], 16  }
  0x25   :  { %296 = vsyncadd [#allocation3], 4294967280 }
  0x26   :  { %297 = dma.done.wait [#allocation6], 1024  }
  0x27   :  { %298 = vsyncadd [#allocation6], 4294966272  ;;  %v305_v0 = vmov 0.0|0.0   ;;  %vm306_vm0 = vmmov 0   ;;  %v307_v1 = vmov 0.0   ;;  %vm51_vm1 = vcmask 523264  }
  0x28   :  { %205 = vmatprep.subr.bf16.mxu0 %v305_v0  ;;  %202 = vmatprep.mubr.msk.f32.mxu0 %vm306_vm0, %v307_v1  ;;  %v42_v2 = vld [vmem:[#allocation5] sm:$0xff]  ;;  %v43_v3 = vld [vmem:[#allocation5 + $0x8] sm:$0xff]  ;;  %vm362_vm2 = vmpackc.low %vm51_vm1, %vm51_vm1  ;;  %s308_s12 = smov [#allocation7]   ;;  %vm150_vm3 = vcmask 516096  }
  0x29   :  { %v206_v5 = vpack.c.bf16 %v43_v3, %v42_v2  ;;  %v44_v6 = vld [vmem:[#allocation5 + $0x10] sm:$0xff]  ;;  %v45_v7 = vld [vmem:[#allocation5 + $0x18] sm:$0xff]  ;;  %v46_v9 = vld [vmem:[#allocation5 + $0x20] sm:$0xff]  ;;  %s158_s13 = sshll.u32 %s308_s12, 4  ;;  %s159_s13 = int_to_ptr.vmem [resolvable:$true] %s158_s13 }
  0x2a   :  { %v210_v8 = vpack.c.bf16 %v45_v7, %v44_v6  ;;  %v47_v10 = vld [vmem:[#allocation5 + $0x28] sm:$0xff]  ;;  %v48_v12 = vld [vmem:[#allocation5 + $0x30] sm:$0xff]  ;;  %v49_v13 = vld [vmem:[#allocation5 + $0x38] sm:$0xff]  ;;  %s273_s14 = scalar_lea.vmem %s159_s13, 16  ;;  %s277_s15 = scalar_lea.vmem %s159_s13, 32 }
  0x2b   :  { %208 = vmatpush3.bf16.xpose.msk.msra.mxu0 %vm362_vm2, %v206_v5  ;;  %v214_v11 = vpack.c.bf16 %v47_v10, %v46_v9  ;;  %v218_v14 = vpack.c.bf16 %v49_v13, %v48_v12  ;;  %v41_v15 = vld [vmem:[#allocation2] sm:$0x1]  ;;  %p274_p2 = scmp.ne.s32.totalorder %s159_s13, %s273_s14  ;;  %p278_p3 = scmp.lt.s32.totalorder %s159_s13, %s159_s13 }
  0x2c   :  { %209 = vmatprep.subr.bf16.mxu0 %v305_v0  ;;  %v50_v16 = vld [vmem:[%s392_s2] sm:$0x1]  ;;  %p279_p4 = scmp.lt.s32.totalorder %s277_s15, %s273_s14 }
  0x2e   :  { %p280_p5 = por %p279_p4, %p278_p3 }
  0x30   :  { %p281_p6 = pnand %p280_p5, %p274_p2 }
  0x33   :  { %212 = vmatpush3.bf16.xpose.msk.msra.mxu0 %vm362_vm2, %v210_v8 }
  0x34   :  { %213 = vmatprep.subr.bf16.mxu0 %v305_v0 }
  0x3b   :  { %216 = vmatpush3.bf16.xpose.msk.msra.mxu0 %vm362_vm2, %v214_v11 }
  0x3c   :  { %217 = vmatprep.subr.bf16.mxu0 %v305_v0 }
  0x43   :  { %220 = vmatpush3.bf16.xpose.msk.msra.mxu0 %vm362_vm2, %v218_v14 }
  0x4a   :  { %203 = vmatmul.mubr.msk.f32.vlgmr.msra.gmra.mrb[0].mxu0 %vm51_vm1, %v41_v15 }
 0x11d   :  { %v145_v17 = vpop.f32.mrb[0].mxu0 }
 0x11e   :  { %v146_v18 = vadd.f32 %v145_v17, %v50_v16  ;;  %v204_v19 = vpop.f32.mrb[1].mxu0 }
 0x120   :  { %v149_v20 = vmax.f32 %v146_v18, 0.0 }
 0x122   :  { %151 = vst.msk [vmem:[#allocation7] sm:$0x1] %vm150_vm3, %v149_v20 }
 0x123   :  { %284 = shalt.err (!%p281_p6)
}
 0x124   :  { %s285_s2 = scalar_lea.hbm %s393_s3, 16 }
 0x125   :  { %p286_p7 = scmp.ne.s32.totalorder %s393_s3, %s285_s2  ;;  %p289_p8 = scmp.lt.u32.totalorder %s285_s2, %s393_s3 }
 0x127   :  { %p291_p9 = pnand %p289_p8, %p286_p7 }
 0x129   :  { %294 = shalt.err (!%p291_p9)
}
 0x12a   :  { %161 = dma.vmem_to_hbm [thread:$0]  %s159_s13, 16, %s393_s3, [#allocation4]  }
 0x12b   :  { %299 = dma.done.wait [#allocation4], 16  }
 0x12c   :  { %300 = vsyncadd [#allocation4], 4294967280 }
 0x12d   :  { %165 = vsyncpa [#allocation3], 1 }
 0x12e   :  { %166 = vsyncpa [#allocation6], 1 }
 0x12f   :  { %167 = vsyncpa [#allocation4], 1 }

</bundles_post_ra>
